<compile_context>
chip_gen: v7x
topology: tpu7x:2x2x1
jax: 0.10.0
libtpu: 0.0.40
codegen_flags: <defaults>
</compile_context>

<pallas_src>
import jax
import jax.numpy as jnp
from jax.experimental import pallas as pl
from jax.experimental.pallas import tpu as pltpu


def _gmm_forward_kernel(x_ref, mk_ref, bias_ref, out_ref):
    # Hot path: MXU matmul (K = dim on the contraction axis) + broadcast bias.
    logits = jnp.dot(x_ref[...], mk_ref[...],
                     preferred_element_type=jnp.float32)        # (tn, kk) f32
    logits = logits - bias_ref[...]                             # (1, kk) bcast

    # Row-wise softmax over kk (lane axis -> cheap in-tile reduction).
    m = jnp.max(logits, axis=1, keepdims=True)
    e = jnp.exp(logits - m)
    denom = jnp.sum(e, axis=1, keepdims=True)
    # Exact divide: denom is only (tn, 1), negligible VALU work, and keeps the
    # softmax accurate to f32 roundoff (approx reciprocal was ~1e-3 off).
    out_ref[...] = (e / denom).astype(out_ref.dtype)


def _round_up(a, b):
    return ((a + b - 1) // b) * b


def variational_gmm_forward(x, mk, rhok, *, tn=512, out_dtype=None):
    """Forward pass of VariationalGMM.

    x: any shape reshapable to (-1, dim); mk, rhok: (dim, kk).
    """
    dim, kk = mk.shape
    x2 = x.reshape(-1, dim)
    n = x2.shape[0]
    out_dtype = out_dtype or x2.dtype

    # ---- Grid-invariant bias, precomputed once on the wrapper side ---------
    mk_f32 = mk.astype(jnp.float32)
    sk = jax.nn.softplus(rhok.astype(jnp.float32))              # stable softplus
    bias = 0.5 * (jnp.sum(mk_f32 * mk_f32, axis=0, keepdims=True)
                  + jnp.sum(sk * sk, axis=0, keepdims=True))    # (1, kk) f32

    # ---- Tile / grid selection ---------------------------------------------
    n_aligned = _round_up(n, 8)
    tn_eff = min(tn, n_aligned)
    tn_eff = _round_up(tn_eff, 8)
    # Give the v7x megacore at least two grid steps when there is enough data.
    if n_aligned // tn_eff < 2 and n_aligned >= 16:
        tn_eff = _round_up(pl.cdiv(n, 2), 8)
    grid_n = pl.cdiv(n, tn_eff)
    n_pad = grid_n * tn_eff
    if n_pad != n:
        x2 = jnp.pad(x2, ((0, n_pad - n), (0, 0)))

    out = pl.pallas_call(
        _gmm_forward_kernel,
        out_shape=jax.ShapeDtypeStruct((n_pad, kk), out_dtype),
        grid_spec=pltpu.PrefetchScalarGridSpec(
            num_scalar_prefetch=0,
            grid=(grid_n,),
            in_specs=[
                pl.BlockSpec((tn_eff, dim), lambda i: (i, 0)),   # x rows tile
                pl.BlockSpec((dim, kk), lambda i: (0, 0)),       # mk (resident)
                pl.BlockSpec((1, kk), lambda i: (0, 0)),         # bias (resident)
            ],
            out_specs=pl.BlockSpec((tn_eff, kk), lambda i: (i, 0)),
        ),
        compiler_params=pltpu.CompilerParams(
            dimension_semantics=("parallel",)),
    )(x2, mk, bias)

    if n_pad != n:
        out = out[:n]
    return out


def reference_forward(x, mk, rhok):
    dim, kk = mk.shape
    x2 = x.reshape(-1, dim).astype(jnp.float32)
    mk_f32 = mk.astype(jnp.float32)
    sk = jax.nn.softplus(rhok.astype(jnp.float32))
    mk2 = jnp.sum(mk_f32 ** 2, axis=0, keepdims=True)
    sk2 = jnp.sum(sk ** 2, axis=0, keepdims=True)
    logits = x2 @ mk_f32 - 0.5 * (mk2 + sk2)
    return jax.nn.softmax(logits, axis=1)


if __name__ == "__main__":
    # Module hyperparameters (small, tile-friendly).
    kk = 128        # number of mixture components
    dim = 32        # feature dimension
    n_total = 1024  # dataset size (only used in losses, not forward)

    key = jax.random.PRNGKey(0)
    k_x, k_mk, k_rhok = jax.random.split(key, 3)

    # Deterministic parameter init mirroring the PyTorch __init__:
    #   mk ~ N(0, 1);  rhok ~ |N(-3, 0.1)|
    mk = jax.random.normal(k_mk, (dim, kk), dtype=jnp.float32)
    rhok = jnp.abs(-3.0 + 0.1 * jax.random.normal(k_rhok, (dim, kk),
                                                  dtype=jnp.float32))
    # std is only used in pa_loss, not in forward.
    # TODO(synk): pa_loss / x_loss / loss (KL + reconstruction) are training
    # losses, not part of forward; not kernelized.

    # Input: (2, 64, 32) -> reshape(-1, dim) gives N=128 rows of dim=32.
    x = jax.random.normal(k_x, (2, 64, dim), dtype=jnp.float32)

    out = variational_gmm_forward(x, mk, rhok)
    out = jax.block_until_ready(out)

    ref = reference_forward(x, mk, rhok)
    assert out.shape == (128, kk), out.shape
    assert jnp.allclose(out, ref, atol=1e-5, rtol=1e-5), \
        f"max err {jnp.max(jnp.abs(out - ref))}"
    # Softmax rows should sum to ~1.
    assert jnp.allclose(jnp.sum(out, axis=1), 1.0, atol=1e-5)

    print("KERNEL_OK")
</pallas_src>

<mosaic_0001>
module attributes {stable_mosaic.version = 11 : i64} {
  func.func @_gmm_forward_kernel(%arg0: i32, %arg1: memref<64x32xf32, #tpu.memory_space<vmem>>, %arg2: memref<32x128xf32, #tpu.memory_space<vmem>>, %arg3: memref<1x128xf32, #tpu.memory_space<vmem>>, %arg4: memref<64x128xf32, #tpu.memory_space<vmem>>) attributes {dimension_semantics = [#tpu.dimension_semantics<parallel>], iteration_bounds = array<i64: 2>, scalar_prefetch = 0 : i64, scratch_operands = 0 : i64, tpu.core_type = #tpu.core_type<tc>, window_params = [{transform_indices = @transform_0, window_bounds = array<i64: 64, 32>}, {pipeline_mode = #tpu.pipeline_mode<synchronous>, transform_indices = @transform_1, window_bounds = array<i64: 32, 128>}, {pipeline_mode = #tpu.pipeline_mode<synchronous>, transform_indices = @transform_2, window_bounds = array<i64: 1, 128>}, {transform_indices = @transform_3, window_bounds = array<i64: 64, 128>}]} {
    %c0 = arith.constant 0 : index
    %c0_0 = arith.constant 0 : index
    %0 = vector.load %arg1[%c0, %c0_0] : memref<64x32xf32, #tpu.memory_space<vmem>>, vector<64x32xf32>
    %c0_1 = arith.constant 0 : index
    %c0_2 = arith.constant 0 : index
    %1 = vector.load %arg2[%c0_1, %c0_2] : memref<32x128xf32, #tpu.memory_space<vmem>>, vector<32x128xf32>
    %cst = arith.constant dense<0.000000e+00> : vector<64x128xf32>
    %2 = tpu.matmul %0, %1, %cst {dimension_numbers = #tpu.dot_dimension_numbers<[1], [0], [0], [1], [0, 0, 1, 1], [], []>} : vector<64x32xf32>, vector<32x128xf32>, vector<64x128xf32> -> vector<64x128xf32>
    %c0_3 = arith.constant 0 : index
    %c0_4 = arith.constant 0 : index
    %3 = vector.load %arg3[%c0_3, %c0_4] : memref<1x128xf32, #tpu.memory_space<vmem>>, vector<1x128xf32>
    %4 = vector.broadcast %3 : vector<1x128xf32> to vector<64x128xf32>
    %5 = arith.subf %2, %4 : vector<64x128xf32>
    %cst_5 = arith.constant dense<0xFF800000> : vector<64xf32>
    %6 = vector.multi_reduction <maximumf>, %5, %cst_5 [1] : vector<64x128xf32> to vector<64xf32>
    %7 = vector.shape_cast %6 : vector<64xf32> to vector<64x1xf32>
    %8 = vector.broadcast %7 : vector<64x1xf32> to vector<64x128xf32>
    %9 = arith.subf %5, %8 : vector<64x128xf32>
    %10 = math.exp %9 : vector<64x128xf32>
    %cst_6 = arith.constant dense<0.000000e+00> : vector<64xf32>
    %11 = vector.multi_reduction <add>, %10, %cst_6 [1] : vector<64x128xf32> to vector<64xf32>
    %12 = vector.shape_cast %11 : vector<64xf32> to vector<64x1xf32>
    %13 = vector.broadcast %12 : vector<64x1xf32> to vector<64x128xf32>
    %14 = arith.divf %10, %13 : vector<64x128xf32>
    %c0_7 = arith.constant 0 : index
    %c0_8 = arith.constant 0 : index
    %15 = vector.load %arg4[%c0_7, %c0_8] : memref<64x128xf32, #tpu.memory_space<vmem>>, vector<64x128xf32>
    tpu.vector_store %arg4[%c0_7, %c0_8], %14 {strides = array<i32>} : memref<64x128xf32, #tpu.memory_space<vmem>>, vector<64x128xf32>,
    return
  }
  func.func @transform_0(%arg0: i32) -> (i32, i32) {
    %c0_i32 = arith.constant 0 : i32
    %c0_i32_0 = arith.constant 0 : i32
    return %arg0, %c0_i32 : i32, i32
  }
  func.func @transform_1(%arg0: i32) -> (i32, i32) {
    %c0_i32 = arith.constant 0 : i32
    %c0_i32_0 = arith.constant 0 : i32
    %c0_i32_1 = arith.constant 0 : i32
    return %c0_i32, %c0_i32_0 : i32, i32
  }
  func.func @transform_2(%arg0: i32) -> (i32, i32) {
    %c0_i32 = arith.constant 0 : i32
    %c0_i32_0 = arith.constant 0 : i32
    %c0_i32_1 = arith.constant 0 : i32
    return %c0_i32, %c0_i32_0 : i32, i32
  }
  func.func @transform_3(%arg0: i32) -> (i32, i32) {
    %c0_i32 = arith.constant 0 : i32
    %c0_i32_0 = arith.constant 0 : i32
    return %arg0, %c0_i32 : i32, i32
  }
}

</mosaic_0001>

<bundles_post_ra>
// kernel: tpu_custom_call.1
= control target key start
LH: loop header
LB: loop body
LE: loop exit
PB: predicated region body
PF: predicated region fallthrough
CT: control target
= control target key end

     0   :  { %8 = vsyncpa [#allocation3], 0  ;;  %s840_s0 = inlined_call_operand.vmem [shape: f32[128,32], index: 0, kind: input, shape index: {}]   ;;  %s841_s1 = inlined_call_operand.vmem [shape: f32[32,128], index: 1, kind: input, shape index: {}]   ;;  %s842_s2 = inlined_call_operand.vmem [shape: f32[1,128], index: 2, kind: input, shape index: {}]   ;;  %s843_s3 = inlined_call_operand.hbm [shape: f32[128,128], index: 3, kind: output, shape index: {}]  }
   0x1   :  { %10 = vsyncpa [#allocation3 + $0x1], 0  ;;  %s711_s12 = smov 0   ;;  %s713_s13 = smov 0  }
   0x2   :  { %s715_s14 = smov 0   ;;  %s717_s15 = smov 0  }
   0x3 LB: > { %s732_s16 = sadd.s32 4294967295, %s686_s15   ;;  %s485_s17 = sadd.s32 4294967294, %s686_s15   ;;  %s686_s15 = sphi %s717_s15, %s849_s15   ;;  %s682_s14 = sphi %s715_s14, %s848_s14   ;;  %s678_s13 = sphi %s713_s13, %s847_s13   ;;  %s674_s12 = sphi %s711_s12, %s846_s12  }
   0x4   : > { %s736_s18 = sadd.s32 1, %s686_s15   ;;  %s91_s19 = sadd.s32 1, %s682_s14 }
   0x5   : > { %s88_s20 = ssub.s32 %s686_s15, %s736_s18  ;;  %p101_p0 = scmp.ne.s32.totalorder %s682_s14, %s678_s13 }
   0x6   : > { %p89_p1 = scmp.eq.s32.totalorder %s88_s20, 0  ;;  %p102_p2 = scmp.eq.s32.totalorder %s732_s16, 1 }
   0x7   : > { %p107_p3 = scmp.ne.s32.totalorder %s678_s13, %s674_s12  ;;  %p108_p4 = scmp.eq.s32.totalorder %s485_s17, 1 }
   0x8   : > { %s747_s21 = scalar_select %p89_p1, %s682_s14, %s91_s19  }
   0x9   : > { %p749_p5 = por %p102_p2, %p101_p0  ;;  %p753_p6 = por %p108_p4, %p107_p3 }
   0xa   : > { %p488_p7 = scmp.ge.s32.totalorder %s686_s15, 1  ;;  %p141_p8 = scmp.lt.s32.totalorder %s686_s15, 3 }
   0xc   : > { %p142_p9 = pnand %p488_p7, %p141_p8 }
   0xd   : > { %v180_v0 = vld [vmem:[%s841_s1] sm:$0xff] (!%p142_p9)  ;;  %v181_v1 = vld [vmem:[%s841_s1 + $0x8] sm:$0xff] (!%p142_p9)  ;;  %v182_v2 = vld [vmem:[%s841_s1 + $0x10] sm:$0xff] (!%p142_p9)  ;;  %s490_s30 = sshll.u32 (!%p142_p9), %s732_s16, 3  ;;  %vm184_vm0 = vcmask (!%p142_p9), 261120   ;;  %s162_s17 = sand.u32 (!%p142_p9), 1, %s678_s13  }
   0xe   : > { %145 = sbr.rel (%p142_p9) target bundleno = 583 (0x247), region = 32  ;;  %v539_v3 = vpack.c.bf16 (!%p142_p9), %v181_v1, %v180_v0  ;;  %v183_v4 = vld [vmem:[%s841_s1 + $0x18] sm:$0xff] (!%p142_p9)  ;;  %p166_p10 = scmp.lt.s32.totalorder (!%p142_p9), %s490_s30, 15  ;;  %v500_v14 = vld [vmem:[%s842_s2] ss:$0 sm:$0xff] (!%p142_p9) }
   0xf   : > { %v543_v5 = vpack.c.bf16 (!%p142_p9), %v183_v4, %v182_v2  ;;  %s489_s19 = sshll.u32 (!%p142_p9), %s162_s17, 6  ;;  %s506_s24 = sshll.u32 (!%p142_p9), %s732_s16, 10 }
  0x10   : > { %540 = vmatprep.subr.bf16.mxu0 (!%p142_p9), %v539_v3  ;;  %547 = vmatprep.subr.bf16.mxu1 (!%p142_p9), %v539_v3  ;;  %s164_s20 = scalar_lea.vmem (!%p142_p9), [#allocation2], %s489_s19  ;;  %s793_s28 = scalar_lea.hbm (!%p142_p9), %s843_s3, %s506_s24 }
  0x11   : > { %542 = vmatpush3.bf16.msra.mxu0 (!%p142_p9), %v539_v3  ;;  %549 = vmatpush3.bf16.msra.mxu1 (!%p142_p9), %v539_v3  ;;  %s423_s25 = sshll.u32 (!%p142_p9), %s164_s20, 4  ;;  %s799_s29 = scalar_lea.sflag (!%p142_p9), [#allocation3], %s162_s17  ;;  %s795_s25 = int_to_ptr.vmem [resolvable:$true] %s423_s25 }
  0x12   : > { %544 = vmatprep.subr.bf16.mxu0 (!%p142_p9), %v543_v5  ;;  %548 = vmatprep.subr.bf16.mxu1 (!%p142_p9), %v543_v5  ;;  %s624_s16 = scalar_lea.vmem (!%p142_p9), %s795_s25, 1024 }
  0x13   : > { %p625_p11 = scmp.ne.s32.totalorder (!%p142_p9), %s795_s25, %s624_s16 }
  0x15   : > { %s851_s30 = smov (!%p166_p10, %s490_s30), 15  ;;  %546 = vmatpush3.bf16.msra.mxu0 %v543_v5  ;;  %550 = vmatpush3.bf16.msra.mxu1 %v543_v5  ;;  %p626_p12 = pnand %p625_p11, %p749_p5 }
  0x16   : > { %s491_s6 = sshll.u32 %s851_s30, 3  ;;  %s688_s30 = smov [#allocation2]  }
  0x17   : > { %s169_s9 = scalar_lea.vmem %s840_s0, %s491_s6  ;;  %p627_p13 = pneg %p626_p12 }
  0x18   : > { %v172_v6 = vld [vmem:[%s169_s9] sm:$0xff]  ;;  %v173_v8 = vld [vmem:[%s169_s9 + $0x8] sm:$0xff]  ;;  %v174_v10 = vld [vmem:[%s169_s9 + $0x10] sm:$0xff]  ;;  %s628_s4 = sshll.u32 %s688_s30, 4  ;;  %s629_s4 = int_to_ptr.vmem [resolvable:$false] %s628_s4 }
  0x19   : > { %v176_v7 = vld [vmem:[%s169_s9 + $0x20] sm:$0xff]  ;;  %v177_v9 = vld [vmem:[%s169_s9 + $0x28] sm:$0xff]  ;;  %527 = vmatprep.mubr.msk.f32.mxu0 %vm184_vm0, %v172_v6  ;;  %v178_v11 = vld [vmem:[%s169_s9 + $0x30] sm:$0xff]  ;;  %s630_s5 = scalar_lea.vmem %s629_s4, 2048  ;;  %p631_p0 = scmp.lt.s32.totalorder %s795_s25, %s629_s4 }
  0x1a   : > { %533 = vmatprep.mubr.msk.f32.mxu1 %vm184_vm0, %v176_v7  ;;  %528 = vmatmul.mubr.msk.f32.vlgmr.msra.gmra.mrb[0].mxu0 %vm184_vm0, %v173_v8  ;;  %v175_v12 = vld [vmem:[%s169_s9 + $0x18] sm:$0xff]  ;;  %p632_p1 = scmp.lt.s32.totalorder %s630_s5, %s624_s16 }
  0x1b   : > { %534 = vmatmul.mubr.msk.f32.vlgmr.msra.gmra.mrb[0].mxu1 %vm184_vm0, %v177_v9  ;;  %530 = vmatprep.mubr.msk.f32.mxu0 %vm184_vm0, %v174_v10  ;;  %v179_v13 = vld [vmem:[%s169_s9 + $0x38] sm:$0xff] }
  0x1c   : > { %536 = vmatprep.mubr.msk.f32.mxu1 %vm184_vm0, %v178_v11  ;;  %p633_p2 = por %p632_p1, %p631_p0 }
  0x1e   : > { %531 = vmatmul.mubr.msk.f32.gmra.mrb[2].mxu0 %vm184_vm0, %v175_v12  ;;  %p634_p3 = pnand %p633_p2, %p627_p13 }
  0x1f   : > { %537 = vmatmul.mubr.msk.f32.gmra.mrb[2].mxu1 %vm184_vm0, %v179_v13 }
  0xed   : > { %v529_v15 = vpop.f32.mrb[0].mxu0 }
  0xee   : > { %v535_v16 = vpop.f32.mrb[0].mxu1  ;;  %v322_v17 = vsub.f32 %v529_v15, %v500_v14  ;;  %v275_v19 = vpop.f32.mrb[1].mxu0 }
  0xef   : > { %v326_v18 = vsub.f32 %v535_v16, %v500_v14  ;;  %v295_v20 = vpop.f32.mrb[1].mxu1  ;;  %v321_v23 = vsub.f32 %v275_v19, %v500_v14 }
  0xf0   : > { %331 = vmax.xlane.f32.xlu0 %v322_v17  ;;  %v325_v28 = vsub.f32 %v295_v20, %v500_v14 }
  0xf1   : > { %339 = vmax.xlane.f32.xlu1 %v326_v18  ;;  %v532_v21 = vpop.f32.mrb[2].mxu0 }
  0xf2   : > { %v538_v22 = vpop.f32.mrb[2].mxu1  ;;  %v324_v24 = vsub.f32 %v532_v21, %v500_v14  ;;  %v285_v25 = vpop.f32.mrb[3].mxu0 }
  0xf3   : > { %v305_v26 = vpop.f32.mrb[3].mxu1  ;;  %v323_v27 = vsub.f32 %v285_v25, %v500_v14  ;;  %v328_v29 = vsub.f32 %v538_v22, %v500_v14 }
  0xf4   : > { %329 = vmax.xlane.f32.xlu0 %v321_v23  ;;  %v327_v30 = vsub.f32 %v305_v26, %v500_v14 }
  0xf5   : > { %335 = vmax.xlane.f32.xlu1 %v324_v24 }
  0xf8   : > { %337 = vmax.xlane.f32.xlu0 %v325_v28 }
  0xf9   : > { %333 = vmax.xlane.f32.xlu1 %v323_v27 }
  0xfc   : > { %341 = vmax.xlane.f32.xlu0 %v327_v30 }
  0xfd   : > { %343 = vmax.xlane.f32.xlu1 %v328_v29 }
 0x17d   : > { %v332_v32 = vpop.xlane.xlu0 %331 }
 0x17e   : > { %v340_v31 = vpop.xlane.xlu1 %339  ;;  %v346_v33 = vsub.f32 %v322_v17, %v332_v32 }
 0x17f   : > { %v350_v34 = vsub.f32 %v326_v18, %v340_v31 }
 0x180   : > { %v355_v35 = vmul.f32 1.442695, %v346_v33 }
 0x181   : > { %v330_v36 = vpop.xlane.xlu0 %329  ;;  %v363_v39 = vmul.f32 1.442695, %v350_v34 }
 0x182   : > { %v336_v37 = vpop.xlane.xlu1 %335  ;;  %v345_v38 = vsub.f32 %v321_v23, %v330_v36  ;;  %592 = vpow2.f32 %v355_v35 }
 0x183   : > { %v348_v40 = vsub.f32 %v324_v24, %v336_v37 }
 0x184   : > { %v353_v41 = vmul.f32 1.442695, %v345_v38 }
 0x185   : > { %v338_v42 = vpop.xlane.xlu0 %337  ;;  %v359_v46 = vmul.f32 1.442695, %v348_v40 }
 0x186   : > { %v334_v43 = vpop.xlane.xlu1 %333  ;;  %594 = vpow2.f32 %v353_v41  ;;  %v349_v44 = vsub.f32 %v325_v28, %v338_v42 }
 0x187   : > { %v347_v45 = vsub.f32 %v323_v27, %v334_v43  ;;  %596 = vpow2.f32 %v363_v39 }
 0x188   : > { %v361_v47 = vmul.f32 1.442695, %v349_v44 }
 0x189   : > { %v342_v48 = vpop.xlane.xlu0 %341  ;;  %v357_v50 = vmul.f32 1.442695, %v347_v45 }
 0x18a   : > { %v344_v49 = vpop.xlane.xlu1 %343  ;;  %598 = vpow2.f32 %v361_v47  ;;  %v351_v51 = vsub.f32 %v327_v30, %v342_v48 }
 0x18b   : > { %v352_v52 = vsub.f32 %v328_v29, %v344_v49  ;;  %600 = vpow2.f32 %v359_v46 }
 0x18c   : > { %v593_v54 = vpop.eup %592  ;;  %602 = vpow2.f32 %v357_v50  ;;  %v365_v55 = vmul.f32 1.442695, %v351_v51 }
 0x18d   : > { %v367_v53 = vmul.f32 1.442695, %v352_v52  ;;  %371 = vadd.xlane.f32.xlu1 %v593_v54 }
 0x18f   : > { %604 = vpow2.f32 %v367_v53 }
 0x190   : > { %v595_v56 = vpop.eup %594  ;;  %606 = vpow2.f32 %v365_v55 }
 0x191   : > { %v597_v57 = vpop.eup %596  ;;  %369 = vadd.xlane.f32.xlu0 %v595_v56 }
 0x192   : > { %379 = vadd.xlane.f32.xlu1 %v597_v57 }
 0x194   : > { %v599_v58 = vpop.eup %598 }
 0x195   : > { %v601_v59 = vpop.eup %600  ;;  %377 = vadd.xlane.f32.xlu0 %v599_v58 }
 0x196   : > { %375 = vadd.xlane.f32.xlu1 %v601_v59  ;;  %v603_v60 = vpop.eup %602 }
 0x199   : > { %v605_v61 = vpop.eup %604  ;;  %373 = vadd.xlane.f32.xlu0 %v603_v60 }
 0x19a   : > { %383 = vadd.xlane.f32.xlu1 %v605_v61  ;;  %v607_v62 = vpop.eup %606 }
 0x19d   : > { %381 = vadd.xlane.f32.xlu0 %v607_v62 }
 0x21a   : > { %v372_v63 = vpop.xlane.xlu1 %371 }
 0x21b   : > { %608 = vrcp.f32 %v372_v63 }
 0x21e   : > { %v370_v0 = vpop.xlane.xlu0 %369 }
 0x21f   : > { %610 = vrcp.f32 %v370_v0  ;;  %v380_v1 = vpop.xlane.xlu1 %379 }
 0x220   : > { %612 = vrcp.f32 %v380_v1 }
 0x222   : > { %v378_v2 = vpop.xlane.xlu0 %377 }
 0x223   : > { %614 = vrcp.f32 %v378_v2  ;;  %v376_v3 = vpop.xlane.xlu1 %375 }
 0x224   : > { %616 = vrcp.f32 %v376_v3 }
 0x225   : > { %v609_v4 = vpop.eup %608 }
 0x226   : > { %v374_v5 = vpop.xlane.xlu0 %373  ;;  %v388_v6 = vmul.f32 %v609_v4, %v593_v54 }
 0x227   : > { %618 = vrcp.f32 %v374_v5  ;;  %v384_v7 = vpop.xlane.xlu1 %383 }
 0x228   : > { %620 = vrcp.f32 %v384_v7  ;;  %402 = vst [vmem:[%s164_s20 + $0x8] sm:$0xff] %v388_v6 }
 0x229   : > { %v611_v8 = vpop.eup %610 }
 0x22a   : > { %v613_v9 = vpop.eup %612  ;;  %v386_v10 = vmul.f32 %v611_v8, %v595_v56  ;;  %v382_v11 = vpop.xlane.xlu0 %381 }
 0x22b   : > { %v396_v12 = vmul.f32 %v613_v9, %v597_v57  ;;  %622 = vrcp.f32 %v382_v11 }
 0x22c   : > { %401 = vst [vmem:[%s164_s20] sm:$0xff] %v386_v10 }
 0x22d   : > { %v615_v13 = vpop.eup %614  ;;  %406 = vst [vmem:[%s164_s20 + $0x28] sm:$0xff] %v396_v12 }
 0x22e   : > { %v617_v14 = vpop.eup %616  ;;  %v394_v15 = vmul.f32 %v615_v13, %v599_v58 }
 0x22f   : > { %v392_v16 = vmul.f32 %v617_v14, %v601_v59 }
 0x230   : > { %405 = vst [vmem:[%s164_s20 + $0x20] sm:$0xff] %v394_v15 }
 0x231   : > { %v619_v17 = vpop.eup %618  ;;  %404 = vst [vmem:[%s164_s20 + $0x18] sm:$0xff] %v392_v16 }
 0x232   : > { %v621_v18 = vpop.eup %620  ;;  %v390_v19 = vmul.f32 %v619_v17, %v603_v60 }
 0x233   : > { %v400_v20 = vmul.f32 %v621_v18, %v605_v61 }
 0x234   : > { %403 = vst [vmem:[%s164_s20 + $0x10] sm:$0xff] %v390_v19 }
 0x235   : > { %v623_v21 = vpop.eup %622  ;;  %408 = vst [vmem:[%s164_s20 + $0x38] sm:$0xff] %v400_v20 }
 0x236   : > { %v398_v22 = vmul.f32 %v623_v21, %v607_v62 }
 0x238   : > { %407 = vst [vmem:[%s164_s20 + $0x30] sm:$0xff] %v398_v22 }
 0x239   : > { %637 = shalt.err (!%p634_p3)
}
 0x23a   : > { %s638_s6 = scalar_lea.hbm %s793_s28, 1024  ;;  %s642_s9 = scalar_lea.hbm %s843_s3, 2048 }
 0x23b   : > { %p639_p4 = scmp.ne.s32.totalorder %s793_s28, %s638_s6  ;;  %p643_p9 = scmp.lt.u32.totalorder %s793_s28, %s843_s3 }
 0x23c   : > { %p644_p10 = scmp.lt.u32.totalorder %s642_s9, %s638_s6  ;;  %p646_p12 = scmp.lt.u32.totalorder %s638_s6, %s793_s28 }
 0x23d   : > { %p640_p7 = pnand %p639_p4, %p749_p5 }
 0x23e   : > { %p645_p11 = por %p644_p10, %p643_p9 }
 0x23f   : > { %p641_p8 = pneg %p640_p7 }
 0x240   : > { %p647_p13 = por %p646_p12, %p645_p11 }
 0x242   : > { %p648_p0 = pnand %p647_p13, %p641_p8 }
 0x244   : > { %651 = shalt.err (!%p648_p0)
}
 0x245   : > { %s689_s17 = smov 128   ;;  %s690_s19 = smov 8  }
 0x246   : > { %551 = dma.vmem_to_hbm [thread:$0]  (%p749_p5), %s795_s25, 1024, %s793_s28, %s799_s29, %s689_s17, %s689_s17, %s690_s19  }
 0x247 PF: > { %p557_p1 = scmp.ge.s32.totalorder %s686_s15, 2  ;;  %s438_s20 = sand.u32 1, %s674_s12  }
 0x248   : > { %s439_s24 = scalar_lea.sflag [#allocation3], %s438_s20 }
 0x249   : > { %p554_p2 = pnand %p557_p1, %p753_p6 }
 0x24b   : > { %669 = dma.done.wait (!%p554_p2), %s439_s24, 1024  }
 0x24c   : > { %671 = vsyncadd (!%p554_p2), %s439_s24, 4294966272  ;;  %p13_p3 = scmp.ge.s32.totalorder %s736_s18, 4   ;;  %s846_s12 = smov %s678_s13 }
 0x24d   : > { %s847_s13 = smov %s682_s14  ;;  %s848_s14 = smov %s747_s21 }
 0x24e   : > { %s849_s15 = smov %s736_s18  ;;  %15 = sbr.rel (!%p13_p3) target bundleno = 3 (0x3), region = 67 }
 0x255   :  { %444 = vsyncpa [#allocation3], 1 }
 0x256   :  { %446 = vsyncpa [#allocation3 + $0x1], 1 }

</bundles_post_ra>
